<compile_context>
chip_gen: v7x
topology: tpu7x:2x2x1
jax: 0.10.0
libtpu: 0.0.40
codegen_flags: <defaults>
</compile_context>

<pallas_src>
import math

import jax
import jax.numpy as jnp
from jax.experimental import pallas as pl
from jax.experimental.pallas import tpu as pltpu


# ---------------------------------------------------------------------------
# Fused graph-conv + attention kernel
#   grid = (row tiles, K tiles).  The K (A@X contraction) axis MUST stay the
#   innermost "arbitrary" axis: the acc reset-at-k==0 / flush-at-k==last pattern
#   relies on it.  Padded rows produce bias-only garbage that the wrapper slices off.
# ---------------------------------------------------------------------------
def gc_fused_kernel(a_ref, xk_ref, xr_ref, diag_ref,
                    wcat_ref, bcat_ref, vatt_ref, catt_ref,
                    part_ref, att_ref, acc_ref):
    k = pl.program_id(1)
    tk = a_ref.shape[1]

    @pl.when(k == 0)
    def _():
        acc_ref[...] = jnp.zeros_like(acc_ref)

    # A streamed from HBM at 1 byte/element (int8; exact only for a 0/1 adjacency),
    # upcast to bf16 right before the dot -> bf16 x bf16 MXU with f32 accumulator.
    # The duplicated contraction operand Xd = [X | X] (bf16) is VMEM-resident
    # (constant index_map below); slice the current K window instead of re-streaming
    # X once per row tile.
    koff = pl.multiple_of(k * tk, tk)
    xk = xk_ref[pl.ds(koff, tk), :]
    acc_ref[...] += jnp.dot(a_ref[...].astype(jnp.bfloat16), xk,
                            preferred_element_type=jnp.float32)   # acc = [A@X | A@X]

    @pl.when(k == pl.num_programs(1) - 1)
    def _():
        tm, two_din = acc_ref.shape
        d_in = two_din // 2
        Xd = xr_ref[...]            # (TM, 2*D_in) f32 duplicated row tile [X | X]
        ax2 = acc_ref[...]          # (TM, 2*D_in) f32 [A@X | A@X]

        # Left half  -> (A + self_loop)@X == A@X + diag(self_loop)*X   (linear0 input)
        # Right half -> (A@X) * X                                      (linear1 input)
        left = jax.lax.broadcasted_iota(jnp.int32, (tm, two_din), 1) < d_in
        xcat = jnp.where(left, ax2 + diag_ref[...] * Xd, ax2 * Xd)

        # linear0 + linear1 fused into ONE (TM, 2*D_in) x (2*D_in, D_out) MXU op.
        part = (jnp.dot(xcat, wcat_ref[...], preferred_element_type=jnp.float32)
                + bcat_ref[...])
        # LeakyReLU (negative_slope = 0.01); dropout = eval-mode identity.
        part = jnp.where(part >= 0.0, part, 0.01 * part)
        # F.normalize: L2 over dim=1, eps=1e-12  ->  part / max(||part||, 1e-12).
        ssq = jnp.sum(part * part, axis=1, keepdims=True)
        part_ref[...] = part * jax.lax.rsqrt(jnp.maximum(ssq, 1e-24))

        # Attention row-sum, fully collapsed:
        #   att_i = (1/sqrt(d)) * sum_j (Q K^T)_ij = X_i . v + c
        # with v = k_sum @ Wq (stored as [v | 0] to match the duplicated X layout) and
        # c = bq . k_sum precomputed in the wrapper.  Written lane-dense as a (1, TM)
        # block (rows -> lanes) instead of a masked (TM, 1) store.
        att_ref[...] = (jax.lax.dot_general(
            vatt_ref[...], Xd, (((1,), (1,)), ((), ())),
            preferred_element_type=jnp.float32) + catt_ref[...])


# ---------------------------------------------------------------------------
# Wrapper helpers
# ---------------------------------------------------------------------------
def _round_up(x: int, m: int) -> int:
    return ((x + m - 1) // m) * m


def _pick_tiles(N: int):
    """Row / K tile sizes.  TM <= 256 keeps >= 2 row tiles for v7x's two TensorCores
    ('parallel' row axis); TK grows toward 2048 only while the zero padding it forces
    stays modest (<= 25% of N)."""
    n128 = _round_up(N, 128)
    TM = 256 if n128 >= 512 else 128
    TK = 128
    for cand in (256, 512, 1024, 2048):
        if cand <= n128 and _round_up(N, max(TM, cand)) - n128 <= n128 // 4:
            TK = cand
    N_pad = _round_up(N, max(TM, TK))
    return TM, TK, N_pad


def _prepare_adjacency(A, N_pad):
    """Pad + cast A to int8 (exact ONLY for a 0/1 adjacency; a weighted / normalized
    adjacency would need bf16 or f32 here).  A is typically static across GCLayer
    calls -- hoist / cache this so the extra read+write pass over A is not paid on
    every forward."""
    N = A.shape[0]
    return jnp.zeros((N_pad, N_pad), jnp.int8).at[:N, :N].set(A.astype(jnp.int8))


# ---------------------------------------------------------------------------
# Wrapper
# ---------------------------------------------------------------------------
def gclayer_forward(mashup_num, A, self_loop, embedding_dim,
                    former_embeddings, new_api_embeddings, params):
    """Returns (part, att_out) mirroring GCLayer.forward (eval mode)."""
    N, D_in = former_embeddings.shape
    D_out = params["w0"].shape[0]
    Nn = mashup_num + new_api_embeddings.shape[0]

    TM, TK, N_pad = _pick_tiles(N)

    # A: dominant HBM stream at 1 byte/element.
    A_p = _prepare_adjacency(A, N_pad)

    # self_loop is a diagonal self-loop matrix: (A+S)@X == A@X + diag(S)*X, so only
    # its diagonal is used (any off-diagonal entries would be silently dropped).
    diag = jnp.diagonal(self_loop).astype(jnp.float32).reshape(N, 1)
    diag_p = jnp.zeros((N_pad, 1), jnp.float32).at[:N, :].set(diag)

    # X duplicated as [X | X]: the contraction then directly yields [A@X | A@X] and
    # the epilogue's two linears fuse into one K=2*D_in matmul.
    Xf = former_embeddings.astype(jnp.float32)
    Xdup = jnp.concatenate([Xf, Xf], axis=1)                           # (N, 2*D_in)
    # bf16 copy: VMEM-resident contraction operand (N_pad * 2*D_in * 2 B; ~4 MiB even
    # at N=16K with double buffering).  f32 copy: per-row-tile exact epilogue math.
    Xk_p = jnp.zeros((N_pad, 2 * D_in), jnp.bfloat16).at[:N, :].set(
        Xdup.astype(jnp.bfloat16))
    Xr_p = jnp.zeros((N_pad, 2 * D_in), jnp.float32).at[:N, :].set(Xdup)

    # linear0 + linear1 fused weights / summed bias.
    wcat = jnp.concatenate(
        [params["w0"].T, params["w1"].T], axis=0).astype(jnp.float32)  # (2*D_in, D_out)
    bcat = (params["b0"] + params["b1"]).reshape(1, D_out).astype(jnp.float32)

    # Attention collapse:
    #   sum_j K_j = (sum_j Xn_j) @ Wk^T + Nn * bk,  scaled by 1/sqrt(d)
    #   att_i     = Q_i . k_sum = X_i . (k_sum @ Wq) + bq . k_sum
    combine_new = jnp.concatenate(
        [former_embeddings[:mashup_num], new_api_embeddings], axis=0
    ).astype(jnp.float32)
    xn_sum = jnp.sum(combine_new, axis=0, keepdims=True)               # (1, D_in)
    k_sum = xn_sum @ params["wk"].T + Nn * params["bk"].reshape(1, D_out)
    k_sum = k_sum / math.sqrt(embedding_dim)                           # (1, D_out)
    v = (k_sum @ params["wq"]).astype(jnp.float32)                     # (1, D_in)
    v_att = jnp.concatenate([v, jnp.zeros_like(v)], axis=1)            # (1, 2*D_in)
    c_att = jnp.sum(k_sum * params["bq"].reshape(1, D_out)).reshape(1, 1).astype(
        jnp.float32)

    grid = (N_pad // TM, N_pad // TK)
    n_k = grid[1]

    # Deeper buffering on the A stream only when there are enough K steps to use it.
    if n_k >= 3:
        a_spec = pl.BlockSpec((TM, TK), lambda i, k: (i, k),
                              pipeline_mode=pl.Buffered(3))
    else:
        a_spec = pl.BlockSpec((TM, TK), lambda i, k: (i, k))

    const2d = lambda i, k: (0, 0)
    in_specs = [
        a_spec,                                            # A tiles (int8)
        pl.BlockSpec((N_pad, 2 * D_in), const2d),          # [X|X] bf16, VMEM-resident
        pl.BlockSpec((TM, 2 * D_in), lambda i, k: (i, 0)), # [X|X] f32 row tile
        pl.BlockSpec((TM, 1), lambda i, k: (i, 0)),        # diag(self_loop) row block
        pl.BlockSpec((2 * D_in, D_out), const2d),          # [W0^T ; W1^T]
        pl.BlockSpec((1, D_out), const2d),                 # b0 + b1
        pl.BlockSpec((1, 2 * D_in), const2d),              # [v | 0]
        pl.BlockSpec((1, 1), const2d),                     # c = bq . k_sum
    ]
    out_specs = [
        pl.BlockSpec((TM, D_out), lambda i, k: (i, 0)),    # part
        pl.BlockSpec((1, TM), lambda i, k: (0, i)),        # att (lane-dense)
    ]

    part_pad, att_pad = pl.pallas_call(
        gc_fused_kernel,
        out_shape=(
            jax.ShapeDtypeStruct((N_pad, D_out), jnp.float32),
            jax.ShapeDtypeStruct((1, N_pad), jnp.float32),
        ),
        grid_spec=pltpu.PrefetchScalarGridSpec(
            num_scalar_prefetch=0,
            grid=grid,
            in_specs=in_specs,
            out_specs=out_specs,
            scratch_shapes=[pltpu.VMEM((TM, 2 * D_in), jnp.float32)],
        ),
        compiler_params=pltpu.CompilerParams(
            dimension_semantics=("parallel", "arbitrary"),
            vmem_limit_bytes=32 * 1024 * 1024),
    )(A_p, Xk_p, Xr_p, diag_p, wcat, bcat, v_att, c_att)

    # Padded rows hold bias-only garbage -- slice before returning.
    return part_pad[:N], att_pad[0, :N]


# ---------------------------------------------------------------------------
# Pure-JAX reference (mirrors the PyTorch module exactly, full f32)
# ---------------------------------------------------------------------------
def gclayer_reference(mashup_num, A, self_loop, embedding_dim,
                      former_embeddings, new_api_embeddings, params):
    AI = A + self_loop
    part1 = (AI @ former_embeddings) @ params["w0"].T + params["b0"]
    left = (A @ former_embeddings) * former_embeddings
    part2 = left @ params["w1"].T + params["b1"]
    part = part1 + part2
    part = jnp.where(part >= 0, part, 0.01 * part)
    norm = jnp.maximum(jnp.sqrt(jnp.sum(part * part, axis=1, keepdims=True)), 1e-12)
    part = part / norm

    combine_new = jnp.concatenate(
        [former_embeddings[:mashup_num], new_api_embeddings], axis=0)
    Q = former_embeddings @ params["wq"].T + params["bq"]
    K = combine_new @ params["wk"].T + params["bk"]
    up = (Q @ K.T) / math.sqrt(embedding_dim)
    att = jnp.sum(up, axis=1)
    return part, att


if __name__ == "__main__":
    key = jax.random.PRNGKey(0)
    ks = jax.random.split(key, 12)

    mashup_num = 8
    api_num = 8
    N = mashup_num + api_num
    D_in = 32
    D_out = 32
    embedding_dim = D_in

    # Synthetic inputs (0/1 adjacency, identity self-loop)
    A = (jax.random.uniform(ks[0], (N, N)) < 0.3).astype(jnp.float32)
    self_loop = jnp.eye(N, dtype=jnp.float32)
    former_embeddings = jax.random.normal(ks[1], (N, D_in), dtype=jnp.float32)
    new_api_embeddings = jax.random.normal(ks[2], (api_num, D_in), dtype=jnp.float32)

    # nn.Linear-style parameters: weight (out, in), bias (out,)
    def init_linear(kw, kb, out_dim, in_dim):
        bound = 1.0 / math.sqrt(in_dim)
        w = jax.random.uniform(kw, (out_dim, in_dim), minval=-bound, maxval=bound,
                               dtype=jnp.float32)
        b = jax.random.uniform(kb, (out_dim,), minval=-bound, maxval=bound,
                               dtype=jnp.float32)
        return w, b

    w0, b0 = init_linear(ks[3], ks[4], D_out, D_in)   # linear0
    w1, b1 = init_linear(ks[5], ks[6], D_out, D_in)   # linear1
    wq, bq = init_linear(ks[7], ks[8], D_out, D_in)   # attention q_linear
    wk, bk = init_linear(ks[9], ks[10], D_out, D_in)  # attention k_linear
    params = dict(w0=w0, b0=b0, w1=w1, b1=b1, wq=wq, bq=bq, wk=wk, bk=bk)

    part, att_out = gclayer_forward(
        mashup_num, A, self_loop, embedding_dim,
        former_embeddings, new_api_embeddings, params)
    jax.block_until_ready((part, att_out))

    part_ref, att_ref = gclayer_reference(
        mashup_num, A, self_loop, embedding_dim,
        former_embeddings, new_api_embeddings, params)

    assert part.shape == (N, D_out) and att_out.shape == (N,)
    # part: the A@X contraction uses a bf16 X operand (mixed precision) -> compare at
    # a bf16-appropriate tolerance.  att: exact f32 path (collapsed algebraically).
    assert jnp.allclose(part, part_ref, atol=1e-2, rtol=1e-2)
    assert jnp.allclose(att_out, att_ref, atol=1e-3, rtol=1e-3)

    print("KERNEL_OK")
</pallas_src>

<mosaic_0001>
module attributes {stable_mosaic.version = 11 : i64} {
  func.func @gc_fused_kernel(%arg0: i32, %arg1: i32, %arg2: memref<128x128xi8, #tpu.memory_space<vmem>>, %arg3: memref<128x64xbf16, #tpu.memory_space<vmem>>, %arg4: memref<128x64xf32, #tpu.memory_space<vmem>>, %arg5: memref<128x1xf32, #tpu.memory_space<vmem>>, %arg6: memref<64x32xf32, #tpu.memory_space<vmem>>, %arg7: memref<1x32xf32, #tpu.memory_space<vmem>>, %arg8: memref<1x64xf32, #tpu.memory_space<vmem>>, %arg9: memref<1x1xf32, #tpu.memory_space<vmem>>, %arg10: memref<128x32xf32, #tpu.memory_space<vmem>>, %arg11: memref<1x128xf32, #tpu.memory_space<vmem>>, %arg12: memref<128x64xf32, #tpu.memory_space<vmem>>) attributes {dimension_semantics = [#tpu.dimension_semantics<parallel>, #tpu.dimension_semantics<arbitrary>], iteration_bounds = array<i64: 1, 1>, scalar_prefetch = 0 : i64, scratch_operands = 1 : i64, tpu.core_type = #tpu.core_type<tc>, window_params = [{transform_indices = @transform_0, window_bounds = array<i64: 128, 128>}, {pipeline_mode = #tpu.pipeline_mode<synchronous>, transform_indices = @transform_1, window_bounds = array<i64: 128, 64>}, {transform_indices = @transform_2, window_bounds = array<i64: 128, 64>}, {transform_indices = @transform_3, window_bounds = array<i64: 128, 1>}, {pipeline_mode = #tpu.pipeline_mode<synchronous>, transform_indices = @transform_4, window_bounds = array<i64: 64, 32>}, {pipeline_mode = #tpu.pipeline_mode<synchronous>, transform_indices = @transform_5, window_bounds = array<i64: 1, 32>}, {pipeline_mode = #tpu.pipeline_mode<synchronous>, transform_indices = @transform_6, window_bounds = array<i64: 1, 64>}, {pipeline_mode = #tpu.pipeline_mode<synchronous>, transform_indices = @transform_7, window_bounds = array<i64: 1, 1>}, {transform_indices = @transform_8, window_bounds = array<i64: 128, 32>}, {transform_indices = @transform_9, window_bounds = array<i64: 1, 128>}]} {
    %c0_i32 = arith.constant 0 : i32
    %0 = arith.cmpi eq, %arg1, %c0_i32 : i32
    %1 = arith.extui %0 : i1 to i32
    %c0_i32_0 = arith.constant 0 : i32
    %2 = arith.cmpi ne, %1, %c0_i32_0 : i32
    scf.if %2 {
      %cst_9 = arith.constant 0.000000e+00 : f32
      %16 = vector.broadcast %cst_9 : f32 to vector<128x64xf32>
      %c0_10 = arith.constant 0 : index
      %c0_11 = arith.constant 0 : index
      %17 = vector.load %arg12[%c0_10, %c0_11] : memref<128x64xf32, #tpu.memory_space<vmem>>, vector<128x64xf32>
      tpu.vector_store %arg12[%c0_10, %c0_11], %16 {strides = array<i32>} : memref<128x64xf32, #tpu.memory_space<vmem>>, vector<128x64xf32>,
    } else {
    }
    %c128_i32 = arith.constant 128 : i32
    %3 = arith.muli %arg1, %c128_i32 : i32
    %4 = tpu.assume_multiple %3, 128 : i32
    %5 = arith.index_cast %4 : i32 to index
    %c0 = arith.constant 0 : index
    %6 = vector.load %arg3[%5, %c0] : memref<128x64xbf16, #tpu.memory_space<vmem>>, vector<128x64xbf16>
    %c0_1 = arith.constant 0 : index
    %c0_2 = arith.constant 0 : index
    %7 = vector.load %arg12[%c0_1, %c0_2] : memref<128x64xf32, #tpu.memory_space<vmem>>, vector<128x64xf32>
    %c0_3 = arith.constant 0 : index
    %c0_4 = arith.constant 0 : index
    %8 = vector.load %arg2[%c0_3, %c0_4] : memref<128x128xi8, #tpu.memory_space<vmem>>, vector<128x128xi8>
    %9 = arith.sitofp %8 : vector<128x128xi8> to vector<128x128xbf16>
    %cst = arith.constant dense<0.000000e+00> : vector<128x64xf32>
    %10 = tpu.matmul %9, %6, %cst {dimension_numbers = #tpu.dot_dimension_numbers<[1], [0], [0], [1], [0, 0, 1, 1], [], []>} : vector<128x128xbf16>, vector<128x64xbf16>, vector<128x64xf32> -> vector<128x64xf32>
    %11 = arith.addf %7, %10 : vector<128x64xf32>
    %c0_5 = arith.constant 0 : index
    %c0_6 = arith.constant 0 : index
    %12 = vector.load %arg12[%c0_5, %c0_6] : memref<128x64xf32, #tpu.memory_space<vmem>>, vector<128x64xf32>
    tpu.vector_store %arg12[%c0_5, %c0_6], %11 {strides = array<i32>} : memref<128x64xf32, #tpu.memory_space<vmem>>, vector<128x64xf32>,
    %c0_i32_7 = arith.constant 0 : i32
    %13 = arith.cmpi eq, %arg1, %c0_i32_7 : i32
    %14 = arith.extui %13 : i1 to i32
    %c0_i32_8 = arith.constant 0 : i32
    %15 = arith.cmpi ne, %14, %c0_i32_8 : i32
    scf.if %15 {
      %c0_9 = arith.constant 0 : index
      %c0_10 = arith.constant 0 : index
      %16 = vector.load %arg4[%c0_9, %c0_10] : memref<128x64xf32, #tpu.memory_space<vmem>>, vector<128x64xf32>
      %c0_11 = arith.constant 0 : index
      %c0_12 = arith.constant 0 : index
      %17 = vector.load %arg12[%c0_11, %c0_12] : memref<128x64xf32, #tpu.memory_space<vmem>>, vector<128x64xf32>
      %18 = tpu.iota {dimensions = array<i32: 1>} : vector<128x64xi32>
      %c32_i32 = arith.constant 32 : i32
      %19 = vector.broadcast %c32_i32 : i32 to vector<128x64xi32>
      %20 = arith.cmpi slt, %18, %19 : vector<128x64xi32>
      %c0_13 = arith.constant 0 : index
      %c0_14 = arith.constant 0 : index
      %21 = vector.load %arg5[%c0_13, %c0_14] : memref<128x1xf32, #tpu.memory_space<vmem>>, vector<128x1xf32>
      %22 = vector.broadcast %21 : vector<128x1xf32> to vector<128x64xf32>
      %23 = arith.mulf %22, %16 : vector<128x64xf32>
      %24 = arith.addf %17, %23 : vector<128x64xf32>
      %25 = arith.mulf %17, %16 : vector<128x64xf32>
      %26 = arith.select %20, %24, %25 : vector<128x64xi1>, vector<128x64xf32>
      %c0_15 = arith.constant 0 : index
      %c0_16 = arith.constant 0 : index
      %27 = vector.load %arg6[%c0_15, %c0_16] : memref<64x32xf32, #tpu.memory_space<vmem>>, vector<64x32xf32>
      %cst_17 = arith.constant dense<0.000000e+00> : vector<128x32xf32>
      %28 = tpu.matmul %26, %27, %cst_17 {dimension_numbers = #tpu.dot_dimension_numbers<[1], [0], [0], [1], [0, 0, 1, 1], [], []>} : vector<128x64xf32>, vector<64x32xf32>, vector<128x32xf32> -> vector<128x32xf32>
      %c0_18 = arith.constant 0 : index
      %c0_19 = arith.constant 0 : index
      %29 = vector.load %arg7[%c0_18, %c0_19] : memref<1x32xf32, #tpu.memory_space<vmem>>, vector<1x32xf32>
      %30 = vector.broadcast %29 : vector<1x32xf32> to vector<128x32xf32>
      %31 = arith.addf %28, %30 : vector<128x32xf32>
      %cst_20 = arith.constant 0.000000e+00 : f32
      %32 = vector.broadcast %cst_20 : f32 to vector<128x32xf32>
      %33 = arith.cmpf oge, %31, %32 : vector<128x32xf32>
      %cst_21 = arith.constant 0.00999999977 : f32
      %34 = vector.broadcast %cst_21 : f32 to vector<128x32xf32>
      %35 = arith.mulf %34, %31 : vector<128x32xf32>
      %36 = arith.select %33, %31, %35 : vector<128x32xi1>, vector<128x32xf32>
      %37 = arith.mulf %36, %36 : vector<128x32xf32>
      %cst_22 = arith.constant dense<0.000000e+00> : vector<128xf32>
      %38 = vector.multi_reduction <add>, %37, %cst_22 [1] : vector<128x32xf32> to vector<128xf32>
      %39 = vector.shape_cast %38 : vector<128xf32> to vector<128x1xf32>
      %cst_23 = arith.constant 1.000000e-24 : f32
      %40 = vector.broadcast %cst_23 : f32 to vector<128x1xf32>
      %41 = arith.maximumf %39, %40 : vector<128x1xf32>
      %42 = math.rsqrt %41 : vector<128x1xf32>
      %43 = vector.broadcast %42 : vector<128x1xf32> to vector<128x32xf32>
      %44 = arith.mulf %36, %43 : vector<128x32xf32>
      %c0_24 = arith.constant 0 : index
      %c0_25 = arith.constant 0 : index
      %45 = vector.load %arg10[%c0_24, %c0_25] : memref<128x32xf32, #tpu.memory_space<vmem>>, vector<128x32xf32>
      tpu.vector_store %arg10[%c0_24, %c0_25], %44 {strides = array<i32>} : memref<128x32xf32, #tpu.memory_space<vmem>>, vector<128x32xf32>,
      %c0_26 = arith.constant 0 : index
      %c0_27 = arith.constant 0 : index
      %46 = vector.load %arg8[%c0_26, %c0_27] : memref<1x64xf32, #tpu.memory_space<vmem>>, vector<1x64xf32>
      %cst_28 = arith.constant dense<0.000000e+00> : vector<1x128xf32>
      %47 = tpu.matmul %46, %16, %cst_28 {dimension_numbers = #tpu.dot_dimension_numbers<[1], [1], [0], [0], [0, 0, 1, 0], [], []>} : vector<1x64xf32>, vector<128x64xf32>, vector<1x128xf32> -> vector<1x128xf32>
      %c0_29 = arith.constant 0 : index
      %c0_30 = arith.constant 0 : index
      %48 = vector.load %arg9[%c0_29, %c0_30] : memref<1x1xf32, #tpu.memory_space<vmem>>, vector<1x1xf32>
      %49 = vector.broadcast %48 : vector<1x1xf32> to vector<1x128xf32>
      %50 = arith.addf %47, %49 : vector<1x128xf32>
      %c0_31 = arith.constant 0 : index
      %c0_32 = arith.constant 0 : index
      %51 = vector.load %arg11[%c0_31, %c0_32] : memref<1x128xf32, #tpu.memory_space<vmem>>, vector<1x128xf32>
      tpu.vector_store %arg11[%c0_31, %c0_32], %50 {strides = array<i32>} : memref<1x128xf32, #tpu.memory_space<vmem>>, vector<1x128xf32>,
    } else {
    }
    return
  }
  func.func @transform_0(%arg0: i32, %arg1: i32) -> (i32, i32) {
    %c0_i32 = arith.constant 0 : i32
    return %arg0, %arg1 : i32, i32
  }
  func.func @transform_1(%arg0: i32, %arg1: i32) -> (i32, i32) {
    %c0_i32 = arith.constant 0 : i32
    %c0_i32_0 = arith.constant 0 : i32
    %c0_i32_1 = arith.constant 0 : i32
    return %c0_i32, %c0_i32_0 : i32, i32
  }
  func.func @transform_2(%arg0: i32, %arg1: i32) -> (i32, i32) {
    %c0_i32 = arith.constant 0 : i32
    %c0_i32_0 = arith.constant 0 : i32
    return %arg0, %c0_i32 : i32, i32
  }
  func.func @transform_3(%arg0: i32, %arg1: i32) -> (i32, i32) {
    %c0_i32 = arith.constant 0 : i32
    %c0_i32_0 = arith.constant 0 : i32
    return %arg0, %c0_i32 : i32, i32
  }
  func.func @transform_4(%arg0: i32, %arg1: i32) -> (i32, i32) {
    %c0_i32 = arith.constant 0 : i32
    %c0_i32_0 = arith.constant 0 : i32
    %c0_i32_1 = arith.constant 0 : i32
    return %c0_i32, %c0_i32_0 : i32, i32
  }
  func.func @transform_5(%arg0: i32, %arg1: i32) -> (i32, i32) {
    %c0_i32 = arith.constant 0 : i32
    %c0_i32_0 = arith.constant 0 : i32
    %c0_i32_1 = arith.constant 0 : i32
    return %c0_i32, %c0_i32_0 : i32, i32
  }
  func.func @transform_6(%arg0: i32, %arg1: i32) -> (i32, i32) {
    %c0_i32 = arith.constant 0 : i32
    %c0_i32_0 = arith.constant 0 : i32
    %c0_i32_1 = arith.constant 0 : i32
    return %c0_i32, %c0_i32_0 : i32, i32
  }
  func.func @transform_7(%arg0: i32, %arg1: i32) -> (i32, i32) {
    %c0_i32 = arith.constant 0 : i32
    %c0_i32_0 = arith.constant 0 : i32
    %c0_i32_1 = arith.constant 0 : i32
    return %c0_i32, %c0_i32_0 : i32, i32
  }
  func.func @transform_8(%arg0: i32, %arg1: i32) -> (i32, i32) {
    %c0_i32 = arith.constant 0 : i32
    %c0_i32_0 = arith.constant 0 : i32
    return %arg0, %c0_i32 : i32, i32
  }
  func.func @transform_9(%arg0: i32, %arg1: i32) -> (i32, i32) {
    %c0_i32 = arith.constant 0 : i32
    %c0_i32_0 = arith.constant 0 : i32
    return %c0_i32, %arg0 : i32, i32
  }
}

</mosaic_0001>

<bundles_post_ra>
// kernel: tpu_custom_call.1
= control target key start
LH: loop header
LB: loop body
LE: loop exit
PB: predicated region body
PF: predicated region fallthrough
CT: control target
= control target key end

     0   :  { %s1964_s0 = inlined_call_operand.vmem [shape: s8[128,128], index: 0, kind: input, shape index: {}]   ;;  %s1965_s1 = inlined_call_operand.vmem [shape: bf16[128,64], index: 1, kind: input, shape index: {}]   ;;  %s1966_s2 = inlined_call_operand.vmem [shape: f32[128,64], index: 2, kind: input, shape index: {}]   ;;  %s1967_s3 = inlined_call_operand.vmem [shape: f32[128,1], index: 3, kind: input, shape index: {}]   ;;  %s1968_s4 = inlined_call_operand.vmem [shape: f32[64,32], index: 4, kind: input, shape index: {}]   ;;  %s1969_s5 = inlined_call_operand.vmem [shape: f32[1,32], index: 5, kind: input, shape index: {}]   ;;  %s1970_s6 = inlined_call_operand.vmem [shape: f32[1,64], index: 6, kind: input, shape index: {}]   ;;  %s1971_s7 = inlined_call_operand.<no memory space> [shape: f32[1,1], index: 7, kind: input, shape index: {}]   ;;  %s1972_s8 = inlined_call_operand.vmem [shape: f32[128,32], index: 8, kind: output, shape index: {0}]   ;;  %s1973_s9 = inlined_call_operand.hbm [shape: f32[1,128], index: 9, kind: output, shape index: {1}]  }
   0x1   :  { %v15_v0 = vstv %s1971_s7 }
   0x2   :  { %16 = vst [vmem:[#allocation3] sm:$0x1] %v15_v0 }
   0x3   :  { %v1280_v1 = vld [vmem:[%s1965_s1] sm:$0xff]   ;;  %v1281_v2 = vld [vmem:[%s1965_s1 + $0x8] sm:$0xff]   ;;  %v1344_v3 = vmov 0   ;;  %v1282_v4 = vld [vmem:[%s1965_s1 + $0x10] sm:$0xff]  }
   0x4   :  { %1278 = vset.pattern.permute.xlu0 %v1344_v3  ;;  %1279 = vset.pattern.permute.xlu1 %v1344_v3  ;;  %v1283_v5 = vld [vmem:[%s1965_s1 + $0x18] sm:$0xff]   ;;  %v1417_v6 = vld [vmem:[%s1964_s0] sm:$0xff]  ;;  %v323_v9 = vld [vmem:[%s1967_s3 + $0x10] sm:$0xff] }
   0x5   :  { %1118 = vmatprep.subr.bf16.mxu0 %v1280_v1  ;;  %v97_v7 = vunpack.c.l.s8.bf16 %v1417_v6  ;;  %v321_v8 = vld [vmem:[%s1967_s3] sm:$0xff]  ;;  %v322_v10 = vld [vmem:[%s1967_s3 + $0x8] sm:$0xff]  ;;  %349 = vperm.xlu1 %1279, %v323_v9   ;;  %v324_v12 = vld [vmem:[%s1967_s3 + $0x18] sm:$0xff] }
   0x6   :  { %1119 = vmatpush3.bf16.msra.mxu0 %v1280_v1  ;;  %339 = vperm.xlu0 %1278, %v321_v8   ;;  %v1284_v11 = vld [vmem:[%s1965_s1 + $0x20] sm:$0xff]  }
   0x7   :  { %1120 = vmatprep.subr.bf16.mxu0 %v1281_v2  ;;  %1134 = vmatprep.mubr.bf16.mxu0 %v97_v7  ;;  %v325_v13 = vld [vmem:[%s1967_s3 + $0x20] sm:$0xff] }
   0xa   :  { %1121 = vmatpush3.bf16.msra.mxu0 %v1281_v2  ;;  %344 = vperm.xlu0 %1278, %v322_v10  }
   0xb   :  { %1122 = vmatprep.subr.bf16.mxu0 %v1282_v4 }
   0xe   :  { %1123 = vmatpush3.bf16.msra.mxu0 %v1282_v4 }
   0xf   :  { %1124 = vmatprep.subr.bf16.mxu0 %v1283_v5 }
  0x12   :  { %1125 = vmatpush3.bf16.msra.mxu0 %v1283_v5 }
  0x13   :  { %17 = vsyncpa [#allocation5], 0  ;;  %1126 = vmatprep.subr.bf16.mxu0 %v1284_v11  ;;  %v1285_v14 = vld [vmem:[%s1965_s1 + $0x28] sm:$0xff]   ;;  %354 = vperm.xlu1 %1279, %v324_v12   ;;  %v327_v16 = vld [vmem:[%s1967_s3 + $0x30] sm:$0xff]  ;;  %v98_v25 = vunpack.c.h.s8.bf16 %v1417_v6  ;;  %vm39_vm0 = vcmask 523264   ;;  %v1345_v28 = vmov 0.0   ;;  %v318_v4 = vlaneseq }
  0x14   :  { %v326_v15 = vld [vmem:[%s1967_s3 + $0x28] sm:$0xff]  ;;  %359 = vperm.xlu0 %1278, %v325_v13   ;;  %v1286_v17 = vld [vmem:[%s1965_s1 + $0x30] sm:$0xff]   ;;  %v328_v18 = vld [vmem:[%s1967_s3 + $0x38] sm:$0xff]  ;;  %42 = vst.msk [vmem:[#allocation2 + $0x10] sm:$0xff] %vm39_vm0, %v1345_v28  ;;  %v1346_v51 = vmov 0.0|0.0   ;;  %vm1347_vm3 = vmmov 0  }
  0x15   :  { %v329_v19 = vld [vmem:[%s1967_s3 + $0x40] sm:$0xff]  ;;  %v1287_v20 = vld [vmem:[%s1965_s1 + $0x38] sm:$0xff]   ;;  %v330_v21 = vld [vmem:[%s1967_s3 + $0x48] sm:$0xff]  ;;  %40 = vst.msk [vmem:[#allocation2] sm:$0xff] %vm39_vm0, %v1345_v28  ;;  %vm753_vm6 = vcmask 261120   ;;  %s1348_s1 = smov [#allocation4]  }
  0x16   :  { %1127 = vmatpush3.bf16.msra.mxu0 %v1284_v11  ;;  %v331_v22 = vld [vmem:[%s1967_s3 + $0x50] sm:$0xff]  ;;  %v94_v23 = vld [vmem:[%s1964_s0 + $0x8] sm:$0xff]  ;;  %v332_v24 = vld [vmem:[%s1967_s3 + $0x58] sm:$0xff]  ;;  %41 = vst.msk [vmem:[#allocation2 + $0x8] sm:$0xff] %vm39_vm0, %v1345_v28  ;;  %v1566_v11 = vand.u32 127, %v318_v4  ;;  %s1007_s11 = sshll.u32 %s1348_s1, 4  ;;  %s1008_s11 = int_to_ptr.vmem [resolvable:$true] %s1007_s11 }
  0x17   :  { %1128 = vmatprep.subr.bf16.mxu0 %v1285_v14  ;;  %364 = vperm.xlu1 %1279, %v326_v15   ;;  %v99_v26 = vunpack.c.l.s8.bf16 %v94_v23  ;;  %v333_v27 = vld [vmem:[%s1967_s3 + $0x60] sm:$0xff]  ;;  %43 = vst.msk [vmem:[#allocation2 + $0x18] sm:$0xff] %vm39_vm0, %v1345_v28  ;;  %44 = vst.msk [vmem:[#allocation2 + $0x20] sm:$0xff] %vm39_vm0, %v1345_v28  ;;  %v334_v29 = vld [vmem:[%s1967_s3 + $0x68] sm:$0xff]  ;;  %v100_v33 = vunpack.c.h.s8.bf16 %v94_v23  ;;  %s1320_s7 = scalar_lea.vmem %s1008_s11, 16  ;;  %p1325_p1 = scmp.lt.s32.totalorder %s1008_s11, %s1008_s11 }
  0x18   :  { %369 = vperm.xlu0 %1278, %v327_v16   ;;  %45 = vst.msk [vmem:[#allocation2 + $0x28] sm:$0xff] %vm39_vm0, %v1345_v28  ;;  %46 = vst.msk [vmem:[#allocation2 + $0x30] sm:$0xff] %vm39_vm0, %v1345_v28  ;;  %v335_v30 = vld [vmem:[%s1967_s3 + $0x70] sm:$0xff]  ;;  %v336_v32 = vld [vmem:[%s1967_s3 + $0x78] sm:$0xff]  ;;  %vm320_vm1 = vcmp.lt.s32.totalorder %v1566_v11, 32  ;;  %p1321_p0 = scmp.ne.s32.totalorder %s1008_s11, %s1320_s7 }
  0x19   :  { %47 = vst.msk [vmem:[#allocation2 + $0x38] sm:$0xff] %vm39_vm0, %v1345_v28  ;;  %48 = vst.msk [vmem:[#allocation2 + $0x40] sm:$0xff] %vm39_vm0, %v1345_v28  ;;  %v95_v31 = vld [vmem:[%s1964_s0 + $0x10] sm:$0xff]  ;;  %v96_v35 = vld [vmem:[%s1964_s0 + $0x18] sm:$0xff] }
  0x1a   :  { %1129 = vmatpush3.bf16.msra.mxu0 %v1285_v14  ;;  %49 = vst.msk [vmem:[#allocation2 + $0x48] sm:$0xff] %vm39_vm0, %v1345_v28  ;;  %50 = vst.msk [vmem:[#allocation2 + $0x50] sm:$0xff] %vm39_vm0, %v1345_v28  ;;  %v101_v34 = vunpack.c.l.s8.bf16 %v95_v31  ;;  %v102_v36 = vunpack.c.h.s8.bf16 %v95_v31  ;;  %v103_v37 = vunpack.c.l.s8.bf16 %v96_v35  ;;  %v104_v38 = vunpack.c.h.s8.bf16 %v96_v35  ;;  %v481_v39 = vld [vmem:[%s1968_s4] sm:$0xff]  ;;  %v482_v40 = vld [vmem:[%s1968_s4 + $0x8] sm:$0xff] }
  0x1b   :  { %1130 = vmatprep.subr.bf16.mxu0 %v1286_v17  ;;  %374 = vperm.xlu1 %1279, %v328_v18   ;;  %51 = vst.msk [vmem:[#allocation2 + $0x58] sm:$0xff] %vm39_vm0, %v1345_v28  ;;  %52 = vst.msk [vmem:[#allocation2 + $0x60] sm:$0xff] %vm39_vm0, %v1345_v28  ;;  %v1225_v41 = vpack.c.bf16 %v482_v40, %v481_v39  ;;  %v483_v42 = vld [vmem:[%s1968_s4 + $0x10] sm:$0xff]  ;;  %v484_v43 = vld [vmem:[%s1968_s4 + $0x18] sm:$0xff] }
  0x1c   :  { %379 = vperm.xlu0 %1278, %v329_v19   ;;  %53 = vst.msk [vmem:[#allocation2 + $0x68] sm:$0xff] %vm39_vm0, %v1345_v28  ;;  %54 = vst.msk [vmem:[#allocation2 + $0x70] sm:$0xff] %vm39_vm0, %v1345_v28  ;;  %v1229_v44 = vpack.c.bf16 %v484_v43, %v483_v42  ;;  %v485_v45 = vld [vmem:[%s1968_s4 + $0x20] sm:$0xff]  ;;  %v486_v46 = vld [vmem:[%s1968_s4 + $0x28] sm:$0xff] }
  0x1d   :  { %55 = vst.msk [vmem:[#allocation2 + $0x78] sm:$0xff] %vm39_vm0, %v1345_v28  ;;  %1226 = vmatprep.subr.bf16.mxu1 %v1225_v41  ;;  %v1233_v47 = vpack.c.bf16 %v486_v46, %v485_v45  ;;  %v487_v48 = vld [vmem:[%s1968_s4 + $0x30] sm:$0xff]  ;;  %v488_v49 = vld [vmem:[%s1968_s4 + $0x38] sm:$0xff]  ;;  %v77_v57 = vld [vmem:[#allocation2] sm:$0xff] }
  0x1e   :  { %1131 = vmatpush3.bf16.msra.mxu0 %v1286_v17  ;;  %1228 = vmatpush3.bf16.msra.mxu1 %v1225_v41  ;;  %v1237_v50 = vpack.c.bf16 %v488_v49, %v487_v48  ;;  %v79_v55 = vld [vmem:[#allocation2 + $0x10] sm:$0xff]  ;;  %v80_v59 = vld [vmem:[#allocation2 + $0x18] sm:$0xff]  ;;  %v78_v62 = vld [vmem:[#allocation2 + $0x8] sm:$0xff] }
  0x1f   :  { %1132 = vmatprep.subr.bf16.mxu0 %v1287_v20  ;;  %384 = vperm.xlu1 %1279, %v330_v21   ;;  %v1557_v7 = vld [vmem:[%s1966_s2 + $0x10] sm:$0xff]  ;;  %v1563_v9 = vld [vmem:[%s1966_s2] sm:$0xff]  ;;  %v287_v12 = vld [vmem:[%s1966_s2 + $0x8] sm:$0xff] }
  0x20   :  { %389 = vperm.xlu0 %1278, %v331_v22   ;;  %1230 = vmatprep.subr.bf16.mxu1 %v1229_v44  ;;  %v83_v8 = vld [vmem:[#allocation2 + $0x30] sm:$0xff]  ;;  %v81_v10 = vld [vmem:[#allocation2 + $0x20] sm:$0xff]  ;;  %v84_v15 = vld [vmem:[#allocation2 + $0x38] sm:$0xff]  ;;  %v1242_v39 = vpack.c.bf16 %v287_v12, %v1563_v9 }
  0x21   :  { %v1575_v17 = vld [vmem:[%s1966_s2 + $0x18] sm:$0xff]  ;;  %v87_v42 = vld [vmem:[#allocation2 + $0x50] sm:$0xff]  ;;  %v1596_v45 = vld [vmem:[%s1966_s2 + $0x20] sm:$0xff] }
  0x22   :  { %1133 = vmatpush3.bf16.msra.mxu0 %v1287_v20  ;;  %1232 = vmatpush3.bf16.msra.mxu1 %v1229_v44  ;;  %v82_v20 = vld [vmem:[#allocation2 + $0x28] sm:$0xff]  ;;  %v85_v46 = vld [vmem:[#allocation2 + $0x40] sm:$0xff]  ;;  %vm1601_vm2 = vmpackc.low %vm39_vm0, %vm39_vm0 }
  0x23   :  { %394 = vperm.xlu1 %1279, %v332_v24   ;;  %1234 = vmatprep.subr.bf16.mxu1 %v1233_v47  ;;  %v1608_v48 = vld [vmem:[%s1966_s2 + $0x30] sm:$0xff]  ;;  %v1613_v49 = vld [vmem:[%s1966_s2 + $0x28] sm:$0xff] }
  0x24   :  { %399 = vperm.xlu0 %1278, %v333_v27  }
  0x25   :  { %1135 = vmatmul.mubr.bf16.vlgmr.msra.gmra.mrb[0].mxu0 %v98_v25 }
  0x26   :  { %1138 = vmatprep.mubr.bf16.mxu0 %v99_v26  ;;  %1236 = vmatpush3.bf16.msra.mxu1 %v1233_v47 }
  0x27   :  { %404 = vperm.xlu1 %1279, %v334_v29   ;;  %1238 = vmatprep.subr.bf16.mxu1 %v1237_v50 }
  0x28   :  { %409 = vperm.xlu0 %1278, %v335_v30  }
  0x2a   :  { %1240 = vmatpush3.bf16.msra.mxu1 %v1237_v50 }
  0x2b   :  { %414 = vperm.xlu1 %1279, %v336_v32   ;;  %1241 = vmatprep.subr.bf16.mxu1 %v1346_v51 }
  0x2d   :  { %1139 = vmatmul.mubr.bf16.gmra.mrb[4].mxu0 %v100_v33 }
  0x2e   :  { %1142 = vmatprep.mubr.bf16.mxu0 %v101_v34 }
  0x35   :  { %1143 = vmatmul.mubr.bf16.gmra.mrb[8].mxu0 %v102_v36 }
  0x36   :  { %1146 = vmatprep.mubr.bf16.mxu0 %v103_v37 }
  0x3d   :  { %1147 = vmatmul.mubr.bf16.gmra.mrb[12].mxu0 %v104_v38 }
  0x84   :  { %v350_v53 = vpop.permute.xlu1 %349 }
  0x85   :  { %v340_v52 = vpop.permute.xlu0 %339  ;;  %v419_v16 = vmul.f32 %v350_v53, %v1557_v7  ;;  %v88_v53 = vld [vmem:[#allocation2 + $0x58] sm:$0xff] }
  0x86   :  { %v417_v21 = vmul.f32 %v340_v52, %v1563_v9 }
  0x89   :  { %v345_v54 = vpop.permute.xlu0 %344 }
  0x8a   :  { %v418_v25 = vmul.f32 %v345_v54, %v287_v12 }
  0x92   :  { %v355_v56 = vpop.permute.xlu1 %354 }
  0x93   :  { %v1547_v63 = vpop.permute.xlu0 %359  ;;  %v420_v31 = vmul.f32 %v355_v56, %v1575_v17 }
  0x96   :  { %v1551_v6 = vpop.permute.xlu1 %364 }
  0x97   :  { %v370_v13 = vpop.permute.xlu0 %369 }
  0x9a   :  { %v1578_v26 = vpop.permute.xlu1 %374 }
  0x9b   :  { %v1588_v40 = vpop.permute.xlu0 %379 }
  0x9e   :  { %v1618_v56 = vpop.permute.xlu1 %384 }
  0xf8   :  { %v1136_v58 = vpop.f32.mrb[0].mxu0 }
  0xf9   :  { %v252_v60 = vadd.f32 %v1136_v58, %v79_v55  ;;  %v187_v61 = vpop.f32.mrb[1].mxu0 }
  0xfa   :  { %v250_v0 = vadd.f32 %v187_v61, %v77_v57  ;;  %v1137_v1 = vpop.f32.mrb[2].mxu0  ;;  %v421_v61 = vmul.f32 %v1547_v63, %v1596_v45 }
  0xfb   :  { %269 = vst.msk [vmem:[#allocation2 + $0x10] sm:$0xff] %vm39_vm0, %v252_v60  ;;  %v253_v2 = vadd.f32 %v1137_v1, %v80_v59  ;;  %v190_v3 = vpop.f32.mrb[3].mxu0  ;;  %v86_v60 = vld [vmem:[#allocation2 + $0x48] sm:$0xff] }
  0xfc   :  { %267 = vst.msk [vmem:[#allocation2] sm:$0xff] %vm39_vm0, %v250_v0  ;;  %v251_v5 = vadd.f32 %v190_v3, %v78_v62  ;;  %v422_v3 = vmul.f32 %v1551_v6, %v1613_v49 }
  0xfd   :  { %270 = vst.msk [vmem:[#allocation2 + $0x18] sm:$0xff] %vm39_vm0, %v253_v2  ;;  %v423_v2 = vmul.f32 %v370_v13, %v1608_v48 }
  0xfe   :  { %268 = vst.msk [vmem:[#allocation2 + $0x8] sm:$0xff] %vm39_vm0, %v251_v5  ;;  %v1634_v5 = vld [vmem:[%s1966_s2 + $0x38] sm:$0xff] }
 0x100   :  { %v1140_v14 = vpop.f32.mrb[4].mxu0 }
 0x101   :  { %v256_v18 = vadd.f32 %v1140_v14, %v83_v8  ;;  %v203_v19 = vpop.f32.mrb[5].mxu0 }
 0x102   :  { %v254_v22 = vadd.f32 %v203_v19, %v81_v10  ;;  %v1141_v23 = vpop.f32.mrb[6].mxu0  ;;  %v304_v24 = vld [vmem:[#allocation2 + $0x10] sm:$0xff]  ;;  %v390_v10 = vpop.permute.xlu0 %389 }
 0x103   :  { %273 = vst.msk [vmem:[#allocation2 + $0x30] sm:$0xff] %vm39_vm0, %v256_v18  ;;  %v257_v27 = vadd.f32 %v1141_v23, %v84_v15  ;;  %v206_v29 = vpop.f32.mrb[7].mxu0  ;;  %v302_v30 = vld [vmem:[#allocation2] sm:$0xff]  ;;  %v435_v36 = vadd.f32 %v419_v16, %v304_v24  ;;  %v451_v37 = vmul.f32 %v304_v24, %v1557_v7  ;;  %v1246_v15 = vpack.c.bf16 %v1575_v17, %v1557_v7  ;;  %v91_v23 = vld [vmem:[#allocation2 + $0x70] sm:$0xff] }
 0x104   :  { %271 = vst.msk [vmem:[#allocation2 + $0x20] sm:$0xff] %vm39_vm0, %v254_v22  ;;  %v255_v32 = vadd.f32 %v206_v29, %v82_v20  ;;  %v433_v33 = vadd.f32 %v417_v21, %v302_v30  ;;  %v449_v34 = vmul.f32 %v302_v30, %v1563_v9  ;;  %v305_v38 = vld [vmem:[#allocation2 + $0x18] sm:$0xff]  ;;  %v424_v21 = vmul.f32 %v1578_v26, %v1634_v5  ;;  %v1662_v26 = vld [vmem:[%s1966_s2 + $0x50] sm:$0xff]  ;;  %v1667_v29 = vld [vmem:[%s1966_s2 + $0x48] sm:$0xff] }
 0x105   :  { %274 = vst.msk [vmem:[#allocation2 + $0x38] sm:$0xff] %vm39_vm0, %v257_v27  ;;  %v303_v35 = vld [vmem:[#allocation2 + $0x8] sm:$0xff]  ;;  %v436_v54 = vadd.f32 %v420_v31, %v305_v38  ;;  %v452_v55 = vmul.f32 %v305_v38, %v1575_v17  ;;  %v467_v59 = vsel %vm320_vm1, %v435_v36, %v451_v37  ;;  %v1656_v17 = vld [vmem:[%s1966_s2 + $0x40] sm:$0xff] }
 0x106   :  { %272 = vst.msk [vmem:[#allocation2 + $0x28] sm:$0xff] %vm39_vm0, %v255_v32  ;;  %v465_v41 = vsel %vm320_vm1, %v433_v33, %v449_v34  ;;  %v434_v43 = vadd.f32 %v418_v25, %v303_v35  ;;  %v450_v44 = vmul.f32 %v303_v35, %v287_v12  ;;  %v395_v25 = vpop.permute.xlu1 %394  ;;  %v89_v27 = vld [vmem:[#allocation2 + $0x60] sm:$0xff]  ;;  %v92_v32 = vld [vmem:[#allocation2 + $0x78] sm:$0xff]  ;;  %v90_v38 = vld [vmem:[#allocation2 + $0x68] sm:$0xff] }
 0x107   :  { %1166 = vmatprep.mubr.msk.f32.mxu1 %vm39_vm0, %v465_v41  ;;  %v468_v13 = vsel %vm320_vm1, %v436_v54, %v452_v55  ;;  %v400_v41 = vpop.permute.xlu0 %399 }
 0x108   :  { %v1144_v50 = vpop.f32.mrb[8].mxu0  ;;  %v466_v52 = vsel %vm320_vm1, %v434_v43, %v450_v44 }
 0x109   :  { %v260_v57 = vadd.f32 %v1144_v50, %v87_v42  ;;  %v219_v58 = vpop.f32.mrb[9].mxu0  ;;  %1167 = vmatmul.mubr.msk.f32.vlgmr.msra.gmra.mrb[0].mxu1 %vm39_vm0, %v466_v52  ;;  %v426_v50 = vmul.f32 %v1618_v56, %v1667_v29  ;;  %v1686_v52 = vld [vmem:[%s1966_s2 + $0x58] sm:$0xff] }
 0x10a   :  { %v258_v62 = vadd.f32 %v219_v58, %v85_v46  ;;  %v1145_v0 = vpop.f32.mrb[10].mxu0  ;;  %1169 = vmatprep.mubr.msk.f32.mxu1 %vm39_vm0, %v467_v59  ;;  %v308_v1 = vld [vmem:[#allocation2 + $0x30] sm:$0xff]  ;;  %1244 = vmatpush3.bf16.xpose.msk.msra.mxu1 %vm1601_vm2, %v1242_v39  ;;  %v425_v39 = vmul.f32 %v1588_v40, %v1656_v17  ;;  %v427_v46 = vmul.f32 %v390_v10, %v1662_v26 }
 0x10b   :  { %277 = vst.msk [vmem:[#allocation2 + $0x50] sm:$0xff] %vm39_vm0, %v260_v57  ;;  %v261_v63 = vadd.f32 %v1145_v0, %v88_v53  ;;  %v222_v8 = vpop.f32.mrb[11].mxu0  ;;  %v306_v9 = vld [vmem:[#allocation2 + $0x20] sm:$0xff]  ;;  %1245 = vmatprep.subr.bf16.mxu1 %v1346_v51  ;;  %v439_v18 = vadd.f32 %v423_v2, %v308_v1  ;;  %v455_v19 = vmul.f32 %v308_v1, %v1608_v48 }
 0x10c   :  { %275 = vst.msk [vmem:[#allocation2 + $0x40] sm:$0xff] %vm39_vm0, %v258_v62  ;;  %v259_v12 = vadd.f32 %v222_v8, %v86_v60  ;;  %v437_v6 = vadd.f32 %v421_v61, %v306_v9  ;;  %v453_v14 = vmul.f32 %v306_v9, %v1596_v45  ;;  %v309_v20 = vld [vmem:[#allocation2 + $0x38] sm:$0xff]  ;;  %v1250_v59 = vpack.c.bf16 %v1613_v49, %v1596_v45  ;;  %v405_v60 = vpop.permute.xlu1 %404  ;;  %v410_v8 = vpop.permute.xlu0 %409  ;;  %v300_v9 = vld [vmem:[%s1966_s2 + $0x70] sm:$0xff] }
 0x10d   :  { %278 = vst.msk [vmem:[#allocation2 + $0x58] sm:$0xff] %vm39_vm0, %v261_v63  ;;  %1170 = vmatmul.mubr.msk.f32.gmra.mrb[2].mxu1 %vm39_vm0, %v468_v13  ;;  %v307_v16 = vld [vmem:[#allocation2 + $0x28] sm:$0xff]  ;;  %v440_v33 = vadd.f32 %v424_v21, %v309_v20  ;;  %v456_v34 = vmul.f32 %v309_v20, %v1634_v5  ;;  %v471_v37 = vsel %vm320_vm1, %v439_v18, %v455_v19  ;;  %v301_v20 = vld [vmem:[%s1966_s2 + $0x78] sm:$0xff] }
 0x10e   :  { %276 = vst.msk [vmem:[#allocation2 + $0x48] sm:$0xff] %vm39_vm0, %v259_v12  ;;  %v469_v22 = vsel %vm320_vm1, %v437_v6, %v453_v14  ;;  %v438_v24 = vadd.f32 %v422_v3, %v307_v16  ;;  %v454_v7 = vmul.f32 %v307_v16, %v1613_v49  ;;  %v428_v2 = vmul.f32 %v395_v25, %v1686_v52  ;;  %v298_v49 = vld [vmem:[%s1966_s2 + $0x60] sm:$0xff]  ;;  %v299_v6 = vld [vmem:[%s1966_s2 + $0x68] sm:$0xff]  ;;  %s1324_s2 = scalar_lea.vmem %s1008_s11, 32 }
 0x10f   :  { %1172 = vmatprep.mubr.msk.f32.mxu1 %vm39_vm0, %v469_v22  ;;  %v472_v57 = vsel %vm320_vm1, %v440_v33, %v456_v34  ;;  %v431_v18 = vmul.f32 %v410_v8, %v300_v9  ;;  %v430_v22 = vmul.f32 %v405_v60, %v299_v6  ;;  %v1254_v25 = vpack.c.bf16 %v1634_v5, %v1608_v48  ;;  %p1326_p2 = scmp.lt.s32.totalorder %s1324_s2, %s1320_s7 }
 0x110   :  { %v1148_v30 = vpop.f32.mrb[12].mxu0  ;;  %v470_v31 = vsel %vm320_vm1, %v438_v24, %v454_v7  ;;  %v415_v19 = vpop.permute.xlu1 %414  ;;  %v1266_v11 = vpack.c.bf16 %v299_v6, %v298_v49 }
 0x111   :  { %v264_v35 = vadd.f32 %v1148_v30, %v91_v23  ;;  %v235_v36 = vpop.f32.mrb[13].mxu0  ;;  %1173 = vmatmul.mubr.msk.f32.gmra.mrb[4].mxu1 %vm39_vm0, %v470_v31  ;;  %v432_v33 = vmul.f32 %v415_v19, %v301_v20  ;;  %p1327_p3 = por %p1326_p2, %p1325_p1 }
 0x112   :  { %v262_v42 = vadd.f32 %v235_v36, %v89_v27  ;;  %v1149_v43 = vpop.f32.mrb[14].mxu0  ;;  %1175 = vmatprep.mubr.msk.f32.mxu1 %vm39_vm0, %v471_v37  ;;  %v312_v44 = vld [vmem:[#allocation2 + $0x50] sm:$0xff]  ;;  %1248 = vmatpush3.bf16.xpose.msk.msra.mxu1 %vm1601_vm2, %v1246_v15  ;;  %v429_v15 = vmul.f32 %v400_v41, %v298_v49  ;;  %v1258_v41 = vpack.c.bf16 %v1667_v29, %v1656_v17 }
 0x113   :  { %281 = vst.msk [vmem:[#allocation2 + $0x70] sm:$0xff] %vm39_vm0, %v264_v35  ;;  %v265_v40 = vadd.f32 %v1149_v43, %v92_v32  ;;  %v238_v53 = vpop.f32.mrb[15].mxu0  ;;  %v310_v54 = vld [vmem:[#allocation2 + $0x40] sm:$0xff]  ;;  %1249 = vmatprep.subr.bf16.mxu1 %v1346_v51  ;;  %v443_v62 = vadd.f32 %v427_v46, %v312_v44  ;;  %v459_v0 = vmul.f32 %v312_v44, %v1662_v26  ;;  %p1328_p4 = pnand %p1327_p3, %p1321_p0 }
 0x114   :  { %279 = vst.msk [vmem:[#allocation2 + $0x60] sm:$0xff] %vm39_vm0, %v262_v42  ;;  %v263_v55 = vadd.f32 %v238_v53, %v90_v38  ;;  %v441_v58 = vadd.f32 %v425_v39, %v310_v54  ;;  %v457_v56 = vmul.f32 %v310_v54, %v1656_v17  ;;  %v313_v1 = vld [vmem:[#allocation2 + $0x58] sm:$0xff]  ;;  %v1262_v42 = vpack.c.bf16 %v1686_v52, %v1662_v26  ;;  %v866_v17 = vld [vmem:[%s1970_s6] sm:$0x1] }
 0x115   :  { %282 = vst.msk [vmem:[#allocation2 + $0x78] sm:$0xff] %vm39_vm0, %v265_v40  ;;  %1176 = vmatmul.mubr.msk.f32.gmra.mrb[6].mxu1 %vm39_vm0, %v472_v57  ;;  %v311_v61 = vld [vmem:[#allocation2 + $0x48] sm:$0xff]  ;;  %v444_v12 = vadd.f32 %v428_v2, %v313_v1  ;;  %v460_v13 = vmul.f32 %v313_v1, %v1686_v52  ;;  %v475_v14 = vsel %vm320_vm1, %v443_v62, %v459_v0  ;;  %v1770_v26 = vld [vmem:[%s1969_s5] ss:$0 sm:$0xff] }
 0x116   :  { %280 = vst.msk [vmem:[#allocation2 + $0x68] sm:$0xff] %vm39_vm0, %v263_v55  ;;  %v473_v3 = vsel %vm320_vm1, %v441_v58, %v457_v56  ;;  %v442_v63 = vadd.f32 %v426_v50, %v311_v61  ;;  %v458_v45 = vmul.f32 %v311_v61, %v1667_v29 }
 0x117   :  { %1178 = vmatprep.mubr.msk.f32.mxu1 %vm39_vm0, %v473_v3  ;;  %v476_v23 = vsel %vm320_vm1, %v444_v12, %v460_v13 }
 0x118   :  { %v474_v10 = vsel %vm320_vm1, %v442_v63, %v458_v45 }
 0x119   :  { %1179 = vmatmul.mubr.msk.f32.gmra.mrb[8].mxu1 %vm39_vm0, %v474_v10 }
 0x11a   :  { %1181 = vmatprep.mubr.msk.f32.mxu1 %vm39_vm0, %v475_v14  ;;  %v316_v16 = vld [vmem:[#allocation2 + $0x70] sm:$0xff]  ;;  %1252 = vmatpush3.bf16.xpose.msk.msra.mxu1 %vm1601_vm2, %v1250_v59 }
 0x11b   :  { %v314_v21 = vld [vmem:[#allocation2 + $0x60] sm:$0xff]  ;;  %1253 = vmatprep.subr.bf16.mxu1 %v1346_v51  ;;  %v447_v30 = vadd.f32 %v431_v18, %v316_v16  ;;  %v463_v31 = vmul.f32 %v316_v16, %v300_v9 }
 0x11c   :  { %v445_v24 = vadd.f32 %v429_v15, %v314_v21  ;;  %v461_v7 = vmul.f32 %v314_v21, %v298_v49  ;;  %v317_v32 = vld [vmem:[#allocation2 + $0x78] sm:$0xff] }
 0x11d   :  { %1182 = vmatmul.mubr.msk.f32.gmra.mrb[10].mxu1 %vm39_vm0, %v476_v23  ;;  %v315_v27 = vld [vmem:[#allocation2 + $0x68] sm:$0xff]  ;;  %v448_v38 = vadd.f32 %v432_v33, %v317_v32  ;;  %v464_v39 = vmul.f32 %v317_v32, %v301_v20  ;;  %v479_v48 = vsel %vm320_vm1, %v447_v30, %v463_v31 }
 0x11e   :  { %v477_v34 = vsel %vm320_vm1, %v445_v24, %v461_v7  ;;  %v446_v35 = vadd.f32 %v430_v22, %v315_v27  ;;  %v462_v36 = vmul.f32 %v315_v27, %v299_v6 }
 0x11f   :  { %1184 = vmatprep.mubr.msk.f32.mxu1 %vm39_vm0, %v477_v34  ;;  %v480_v5 = vsel %vm320_vm1, %v448_v38, %v464_v39 }
 0x120   :  { %v478_v37 = vsel %vm320_vm1, %v446_v35, %v462_v36 }
 0x121   :  { %1185 = vmatmul.mubr.msk.f32.gmra.mrb[12].mxu1 %vm39_vm0, %v478_v37 }
 0x122   :  { %1187 = vmatprep.mubr.msk.f32.mxu1 %vm39_vm0, %v479_v48  ;;  %1256 = vmatpush3.bf16.xpose.msk.msra.mxu1 %vm1601_vm2, %v1254_v25 }
 0x123   :  { %1257 = vmatprep.subr.bf16.mxu1 %v1346_v51 }
 0x125   :  { %1188 = vmatmul.mubr.msk.f32.gmra.mrb[14].mxu1 %vm39_vm0, %v480_v5 }
 0x126   :  { %1222 = vmatprep.mubr.msk.f32.mxu1 %vm1347_vm3, %v1345_v28  ;;  %v1270_v28 = vpack.c.bf16 %v301_v20, %v300_v9 }
 0x12a   :  { %1260 = vmatpush3.bf16.xpose.msk.msra.mxu1 %vm1601_vm2, %v1258_v41 }
 0x12b   :  { %1261 = vmatprep.subr.bf16.mxu1 %v1346_v51 }
 0x132   :  { %1264 = vmatpush3.bf16.xpose.msk.msra.mxu1 %vm1601_vm2, %v1262_v42 }
 0x133   :  { %1265 = vmatprep.subr.bf16.mxu1 %v1346_v51 }
 0x13a   :  { %1268 = vmatpush3.bf16.xpose.msk.msra.mxu1 %vm1601_vm2, %v1266_v11 }
 0x13b   :  { %1269 = vmatprep.subr.bf16.mxu1 %v1346_v51 }
 0x142   :  { %1272 = vmatpush3.bf16.xpose.msk.msra.mxu1 %vm1601_vm2, %v1270_v28 }
 0x149   :  { %1223 = vmatmul.mubr.msk.f32.vlgmr.msra.gmra.mrb[16].mxu1 %vm39_vm0, %v866_v17 }
 0x1dc   :  { %v1168_v29 = vpop.f32.mrb[0].mxu1 }
 0x1dd   :  { %v616_v43 = vadd.f32 %v1168_v29, %v1770_v26  ;;  %v610_v44 = vpop.f32.mrb[1].mxu1 }
 0x1de   :  { %v611_v51 = vadd.f32 %v1770_v26, %v610_v44 }
 0x1df   :  { %vm690_vm4 = vcmp.ge.f32.partialorder %v616_v43, 0.0  ;;  %v706_v47 = vmul.f32 0.01, %v616_v43 }
 0x1e0   :  { %vm689_vm5 = vcmp.ge.f32.partialorder %v611_v51, 0.0  ;;  %v705_v46 = vmul.f32 0.01, %v611_v51  ;;  %v1171_v50 = vpop.f32.mrb[2].mxu1 }
 0x1e1   :  { %v626_v52 = vadd.f32 %v1171_v50, %v1770_v26  ;;  %v620_v40 = vpop.f32.mrb[3].mxu1  ;;  %v1775_v53 = vsel %vm690_vm4, %v616_v43, %v706_v47 }
 0x1e2   :  { %v621_v54 = vadd.f32 %v1770_v26, %v620_v40  ;;  %v738_v55 = vmul.f32 %v1775_v53, %v1775_v53  ;;  %v1780_v57 = vsel %vm689_vm5, %v611_v51, %v705_v46 }
 0x1e3   :  { %vm692_vm7 = vcmp.ge.f32.partialorder %v626_v52, 0.0  ;;  %v708_v58 = vmul.f32 0.01, %v626_v52  ;;  %v737_v56 = vmul.f32 %v1780_v57, %v1780_v57 }
 0x1e4   :  { %vm691_vm8 = vcmp.ge.f32.partialorder %v621_v54, 0.0  ;;  %v707_v59 = vmul.f32 0.01, %v621_v54  ;;  %v1174_v60 = vpop.f32.mrb[4].mxu1  ;;  %v757_v61 = vsel %vm753_vm6, %v738_v55, 0.0 }
 0x1e5   :  { %v636_v62 = vadd.f32 %v1174_v60, %v1770_v26  ;;  %758 = vadd.xlane.f32.xlu1 %v757_v61  ;;  %v630_v0 = vpop.f32.mrb[5].mxu1  ;;  %v754_v1 = vsel %vm753_vm6, %v737_v56, 0.0  ;;  %v1787_v2 = vsel %vm692_vm7, %v626_v52, %v708_v58 }
 0x1e6   :  { %v631_v3 = vadd.f32 %v1770_v26, %v630_v0  ;;  %755 = vadd.xlane.f32.xlu0 %v754_v1  ;;  %v740_v63 = vmul.f32 %v1787_v2, %v1787_v2  ;;  %v1792_v45 = vsel %vm691_vm8, %v621_v54, %v707_v59 }
 0x1e7   :  { %vm694_vm9 = vcmp.ge.f32.partialorder %v636_v62, 0.0  ;;  %v710_v49 = vmul.f32 0.01, %v636_v62  ;;  %v739_v6 = vmul.f32 %v1792_v45, %v1792_v45 }
 0x1e8   :  { %vm693_vm10 = vcmp.ge.f32.partialorder %v631_v3, 0.0  ;;  %v709_v8 = vmul.f32 0.01, %v631_v3  ;;  %v1177_v9 = vpop.f32.mrb[6].mxu1  ;;  %v763_v10 = vsel %vm753_vm6, %v740_v63, 0.0 }
 0x1e9   :  { %v646_v12 = vadd.f32 %v1177_v9, %v1770_v26  ;;  %v640_v13 = vpop.f32.mrb[7].mxu1  ;;  %v1801_v16 = vsel %vm694_vm9, %v636_v62, %v710_v49  ;;  %v760_v7 = vsel %vm753_vm6, %v739_v6, 0.0 }
 0x1ea   :  { %v641_v14 = vadd.f32 %v1770_v26, %v640_v13  ;;  %764 = vadd.xlane.f32.xlu0 %v763_v10  ;;  %v1799_v15 = vsel %vm693_vm10, %v631_v3, %v709_v8  ;;  %v742_v25 = vmul.f32 %v1801_v16, %v1801_v16 }
 0x1eb   :  { %vm696_vm11 = vcmp.ge.f32.partialorder %v646_v12, 0.0  ;;  %v712_v18 = vmul.f32 0.01, %v646_v12  ;;  %v741_v19 = vmul.f32 %v1799_v15, %v1799_v15 }
 0x1ec   :  { %vm695_vm12 = vcmp.ge.f32.partialorder %v641_v14, 0.0  ;;  %v711_v20 = vmul.f32 0.01, %v641_v14  ;;  %v1180_v21 = vpop.f32.mrb[8].mxu1  ;;  %v769_v39 = vsel %vm753_vm6, %v742_v25, 0.0 }
 0x1ed   :  { %v656_v22 = vadd.f32 %v1180_v21, %v1770_v26  ;;  %v650_v23 = vpop.f32.mrb[9].mxu1  ;;  %v766_v24 = vsel %vm753_vm6, %v741_v19, 0.0  ;;  %v1813_v31 = vsel %vm696_vm11, %v646_v12, %v712_v18 }
 0x1ee   :  { %v651_v27 = vadd.f32 %v1770_v26, %v650_v23  ;;  %767 = vadd.xlane.f32.xlu1 %v766_v24  ;;  %761 = vadd.xlane.f32.xlu0 %v760_v7  ;;  %v1811_v30 = vsel %vm695_vm12, %v641_v14, %v711_v20  ;;  %v744_v48 = vmul.f32 %v1813_v31, %v1813_v31 }
 0x1ef   :  { %vm698_vm13 = vcmp.ge.f32.partialorder %v656_v22, 0.0  ;;  %v714_v32 = vmul.f32 0.01, %v656_v22  ;;  %v743_v33 = vmul.f32 %v1811_v30, %v1811_v30 }
 0x1f0   :  { %vm697_vm14 = vcmp.ge.f32.partialorder %v651_v27, 0.0  ;;  %v713_v34 = vmul.f32 0.01, %v651_v27  ;;  %v1183_v35 = vpop.f32.mrb[10].mxu1  ;;  %v775_v47 = vsel %vm753_vm6, %v744_v48, 0.0 }
 0x1f1   :  { %v666_v36 = vadd.f32 %v1183_v35, %v1770_v26  ;;  %v660_v37 = vpop.f32.mrb[11].mxu1  ;;  %v772_v38 = vsel %vm753_vm6, %v743_v33, 0.0  ;;  %v1825_v42 = vsel %vm698_vm13, %v656_v22, %v714_v32  ;;  %v867_v22 = vld [vmem:[#allocation3] sm:$0x1] }
 0x1f2   :  { %v661_v5 = vadd.f32 %v1770_v26, %v660_v37  ;;  %773 = vadd.xlane.f32.xlu1 %v772_v38  ;;  %770 = vadd.xlane.f32.xlu0 %v769_v39  ;;  %v1823_v41 = vsel %vm697_vm14, %v651_v27, %v713_v34  ;;  %v746_v46 = vmul.f32 %v1825_v42, %v1825_v42 }
 0x1f3   :  { %vm700_vm15 = vcmp.ge.f32.partialorder %v666_v36, 0.0  ;;  %v716_v11 = vmul.f32 0.01, %v666_v36  ;;  %v745_v28 = vmul.f32 %v1823_v41, %v1823_v41 }
 0x1f4   :  { %vm699_vm0 = vcmp.ge.f32.partialorder %v661_v5, 0.0  ;;  %v715_v17 = vmul.f32 0.01, %v661_v5  ;;  %v1186_v29 = vpop.f32.mrb[12].mxu1  ;;  %v781_v62 = vsel %vm753_vm6, %v746_v46, 0.0 }
 0x1f5   :  { %v676_v43 = vadd.f32 %v1186_v29, %v1770_v26  ;;  %v670_v44 = vpop.f32.mrb[13].mxu1  ;;  %v778_v51 = vsel %vm753_vm6, %v745_v28, 0.0  ;;  %v1837_v40 = vsel %vm700_vm15, %v666_v36, %v716_v11 }
 0x1f6   :  { %v671_v50 = vadd.f32 %v1770_v26, %v670_v44  ;;  %779 = vadd.xlane.f32.xlu1 %v778_v51  ;;  %776 = vadd.xlane.f32.xlu0 %v775_v47  ;;  %v1835_v52 = vsel %vm699_vm0, %v661_v5, %v715_v17  ;;  %v748_v0 = vmul.f32 %v1837_v40, %v1837_v40 }
 0x1f7   :  { %vm702_vm1 = vcmp.ge.f32.partialorder %v676_v43, 0.0  ;;  %v718_v54 = vmul.f32 0.01, %v676_v43  ;;  %v747_v55 = vmul.f32 %v1835_v52, %v1835_v52 }
 0x1f8   :  { %vm701_vm2 = vcmp.ge.f32.partialorder %v671_v50, 0.0  ;;  %v717_v58 = vmul.f32 0.01, %v671_v50  ;;  %v1189_v56 = vpop.f32.mrb[14].mxu1  ;;  %v787_v12 = vsel %vm753_vm6, %v748_v0, 0.0 }
 0x1f9   :  { %v686_v59 = vadd.f32 %v1189_v56, %v1770_v26  ;;  %v680_v60 = vpop.f32.mrb[15].mxu1  ;;  %v784_v61 = vsel %vm753_vm6, %v747_v55, 0.0  ;;  %v1849_v63 = vsel %vm702_vm1, %v676_v43, %v718_v54 }
 0x1fa   :  { %v681_v1 = vadd.f32 %v1770_v26, %v680_v60  ;;  %785 = vadd.xlane.f32.xlu1 %v784_v61  ;;  %782 = vadd.xlane.f32.xlu0 %v781_v62  ;;  %v1847_v3 = vsel %vm701_vm2, %v671_v50, %v717_v58  ;;  %v750_v26 = vmul.f32 %v1849_v63, %v1849_v63 }
 0x1fb   :  { %vm704_vm3 = vcmp.ge.f32.partialorder %v686_v59, 0.0  ;;  %v720_v49 = vmul.f32 0.01, %v686_v59  ;;  %v749_v8 = vmul.f32 %v1847_v3, %v1847_v3 }
 0x1fc   :  { %vm703_vm4 = vcmp.ge.f32.partialorder %v681_v1, 0.0  ;;  %v719_v9 = vmul.f32 0.01, %v681_v1  ;;  %v793_v19 = vsel %vm753_vm6, %v750_v26, 0.0 }
 0x1fd   :  { %v790_v10 = vsel %vm753_vm6, %v749_v8, 0.0  ;;  %v1859_v6 = vsel %vm704_vm3, %v686_v59, %v720_v49 }
 0x1fe   :  { %791 = vadd.xlane.f32.xlu1 %v790_v10  ;;  %788 = vadd.xlane.f32.xlu0 %v787_v12  ;;  %v1857_v13 = vsel %vm703_vm4, %v681_v1, %v719_v9  ;;  %v752_v20 = vmul.f32 %v1859_v6, %v1859_v6 }
 0x1ff   :  { %v751_v14 = vmul.f32 %v1857_v13, %v1857_v13 }
 0x200   :  { %v799_v21 = vsel %vm753_vm6, %v752_v20, 0.0 }
 0x201   :  { %v796_v18 = vsel %vm753_vm6, %v751_v14, 0.0 }
 0x202   :  { %797 = vadd.xlane.f32.xlu1 %v796_v18  ;;  %794 = vadd.xlane.f32.xlu0 %v793_v19 }
 0x206   :  { %800 = vadd.xlane.f32.xlu0 %v799_v21 }
 0x213   :  { %870 = vperm.xlu1 %1279, %v867_v22  }
 0x21c   :  { %v1868_v23 = vpop.f32.mrb[16].mxu1 }
 0x21d   :  { %v1224_v24 = vpop.f32.mrb[17].mxu1 }
 0x272   :  { %v759_v7 = vpop.xlane.xlu1 %758 }
 0x273   :  { %v803_v25 = vmax.f32 %v759_v7, 1e-24  ;;  %v756_v27 = vpop.xlane.xlu0 %755 }
 0x274   :  { %v802_v32 = vmax.f32 %v756_v27, 1e-24 }
 0x275   :  { %1288 = vrsqrt.f32 %v803_v25 }
 0x276   :  { %1290 = vrsqrt.f32 %v802_v32 }
 0x277   :  { %v765_v33 = vpop.xlane.xlu0 %764 }
 0x278   :  { %v805_v34 = vmax.f32 %v765_v33, 1e-24 }
 0x27a   :  { %1292 = vrsqrt.f32 %v805_v34 }
 0x27b   :  { %v768_v35 = vpop.xlane.xlu1 %767  ;;  %v762_v36 = vpop.xlane.xlu0 %761 }
 0x27c   :  { %v806_v37 = vmax.f32 %v768_v35, 1e-24  ;;  %v804_v38 = vmax.f32 %v762_v36, 1e-24 }
 0x27e   :  { %1294 = vrsqrt.f32 %v806_v37 }
 0x27f   :  { %v1289_v39 = vpop.eup %1288  ;;  %1296 = vrsqrt.f32 %v804_v38  ;;  %v774_v48 = vpop.xlane.xlu1 %773 }
 0x280   :  { %v771_v5 = vpop.xlane.xlu0 %770  ;;  %v1291_v11 = vpop.eup %1290  ;;  %v835_v28 = vmul.f32 %v1289_v39, %v1775_v53  ;;  %v808_v17 = vmax.f32 %v774_v48, 1e-24 }
 0x281   :  { %v807_v29 = vmax.f32 %v771_v5, 1e-24  ;;  %v834_v43 = vmul.f32 %v1291_v11, %v1780_v57 }
 0x282   :  { %851 = vst.msk [vmem:[%s1972_s8 + $0x8] sm:$0xff] %vm753_vm6, %v835_v28  ;;  %1298 = vrsqrt.f32 %v808_v17 }
 0x283   :  { %850 = vst.msk [vmem:[%s1972_s8] sm:$0xff] %vm753_vm6, %v834_v43  ;;  %1300 = vrsqrt.f32 %v807_v29  ;;  %v780_v44 = vpop.xlane.xlu1 %779 }
 0x284   :  { %v777_v51 = vpop.xlane.xlu0 %776  ;;  %v1293_v47 = vpop.eup %1292  ;;  %v810_v53 = vmax.f32 %v780_v44, 1e-24 }
 0x285   :  { %v809_v46 = vmax.f32 %v777_v51, 1e-24  ;;  %v837_v50 = vmul.f32 %v1293_v47, %v1787_v2 }
 0x286   :  { %1302 = vrsqrt.f32 %v810_v53 }
 0x287   :  { %853 = vst.msk [vmem:[%s1972_s8 + $0x18] sm:$0xff] %vm753_vm6, %v837_v50  ;;  %1304 = vrsqrt.f32 %v809_v46  ;;  %v786_v57 = vpop.xlane.xlu1 %785 }
 0x288   :  { %v783_v54 = vpop.xlane.xlu0 %782  ;;  %v1295_v55 = vpop.eup %1294  ;;  %v812_v58 = vmax.f32 %v786_v57, 1e-24 }
 0x289   :  { %v811_v56 = vmax.f32 %v783_v54, 1e-24  ;;  %v1297_v59 = vpop.eup %1296  ;;  %v838_v60 = vmul.f32 %v1295_v55, %v1799_v15  ;;  %v874_v15 = vshrl.u32 %v318_v4, 7 }
 0x28a   :  { %v836_v61 = vmul.f32 %v1297_v59, %v1792_v45  ;;  %1306 = vrsqrt.f32 %v812_v58 }
 0x28b   :  { %854 = vst.msk [vmem:[%s1972_s8 + $0x20] sm:$0xff] %vm753_vm6, %v838_v60  ;;  %1308 = vrsqrt.f32 %v811_v56  ;;  %v792_v2 = vpop.xlane.xlu1 %791 }
 0x28c   :  { %v789_v62 = vpop.xlane.xlu0 %788  ;;  %v1299_v0 = vpop.eup %1298  ;;  %852 = vst.msk [vmem:[%s1972_s8 + $0x10] sm:$0xff] %vm753_vm6, %v836_v61  ;;  %v814_v1 = vmax.f32 %v792_v2, 1e-24 }
 0x28d   :  { %v813_v49 = vmax.f32 %v789_v62, 1e-24  ;;  %v1301_v45 = vpop.eup %1300  ;;  %v840_v8 = vmul.f32 %v1299_v0, %v1811_v30  ;;  %v875_v30 = vsub.s32 0, %v874_v15 }
 0x28e   :  { %v839_v9 = vmul.f32 %v1301_v45, %v1801_v16  ;;  %1310 = vrsqrt.f32 %v814_v1 }
 0x28f   :  { %856 = vst.msk [vmem:[%s1972_s8 + $0x30] sm:$0xff] %vm753_vm6, %v840_v8  ;;  %1312 = vrsqrt.f32 %v813_v49  ;;  %v798_v10 = vpop.xlane.xlu1 %797 }
 0x290   :  { %v795_v12 = vpop.xlane.xlu0 %794  ;;  %v1303_v26 = vpop.eup %1302  ;;  %855 = vst.msk [vmem:[%s1972_s8 + $0x28] sm:$0xff] %vm753_vm6, %v839_v9  ;;  %v816_v4 = vmax.f32 %v798_v10, 1e-24 }
 0x291   :  { %v815_v14 = vmax.f32 %v795_v12, 1e-24  ;;  %v1305_v18 = vpop.eup %1304  ;;  %v842_v16 = vmul.f32 %v1303_v26, %v1823_v41 }
 0x292   :  { %v841_v19 = vmul.f32 %v1305_v18, %v1813_v31  ;;  %1314 = vrsqrt.f32 %v816_v4 }
 0x293   :  { %858 = vst.msk [vmem:[%s1972_s8 + $0x40] sm:$0xff] %vm753_vm6, %v842_v16  ;;  %1316 = vrsqrt.f32 %v815_v14  ;;  %v871_v20 = vpop.permute.xlu1 %870 }
 0x294   :  { %v801_v21 = vpop.xlane.xlu0 %800  ;;  %v1307_v22 = vpop.eup %1306  ;;  %857 = vst.msk [vmem:[%s1972_s8 + $0x38] sm:$0xff] %vm753_vm6, %v841_v19  ;;  %v876_v41 = vrot.slane %v871_v20, %v875_v30 }
 0x295   :  { %v817_v24 = vmax.f32 %v801_v21, 1e-24  ;;  %v1309_v31 = vpop.eup %1308  ;;  %v844_v7 = vmul.f32 %v1307_v22, %v1835_v52 }
 0x296   :  { %v843_v25 = vmul.f32 %v1309_v31, %v1825_v42  ;;  %v995_v27 = vadd.f32 %v1868_v23, %v876_v41 }
 0x297   :  { %1318 = vrsqrt.f32 %v817_v24  ;;  %860 = vst.msk [vmem:[%s1972_s8 + $0x50] sm:$0xff] %vm753_vm6, %v844_v7 }
 0x298   :  { %v1311_v32 = vpop.eup %1310  ;;  %859 = vst.msk [vmem:[%s1972_s8 + $0x48] sm:$0xff] %vm753_vm6, %v843_v25  ;;  %998 = vst [vmem:[#allocation4] sm:$0x1] %v995_v27 }
 0x299   :  { %v1313_v33 = vpop.eup %1312  ;;  %v846_v52 = vmul.f32 %v1311_v32, %v1847_v3 }
 0x29a   :  { %1331 = shalt.err (!%p1328_p4)
}
 0x29b   :  { %s1332_s19 = scalar_lea.hbm %s1973_s9, 16 }
 0x29c   :  { %p1333_p5 = scmp.ne.s32.totalorder %s1973_s9, %s1332_s19  ;;  %p1336_p6 = scmp.lt.u32.totalorder %s1332_s19, %s1973_s9 }
 0x29e   :  { %p1338_p7 = pnand %p1336_p6, %p1333_p5 }
 0x2a0   :  { %1341 = shalt.err (!%p1338_p7)
}
 0x2a1   :  { %1010 = dma.vmem_to_hbm [thread:$0]  %s1008_s11, 16, %s1973_s9, [#allocation5]   ;;  %v845_v42 = vmul.f32 %v1313_v33, %v1837_v40  ;;  %862 = vst.msk [vmem:[%s1972_s8 + $0x60] sm:$0xff] %vm753_vm6, %v846_v52  ;;  %v1315_v3 = vpop.eup %1314 }
 0x2a2   :  { %v1317_v23 = vpop.eup %1316  ;;  %v848_v34 = vmul.f32 %v1315_v3, %v1857_v13 }
 0x2a3   :  { %861 = vst.msk [vmem:[%s1972_s8 + $0x58] sm:$0xff] %vm753_vm6, %v845_v42  ;;  %v847_v35 = vmul.f32 %v1317_v23, %v1849_v63  ;;  %v1319_v40 = vpop.eup %1318 }
 0x2a4   :  { %864 = vst.msk [vmem:[%s1972_s8 + $0x70] sm:$0xff] %vm753_vm6, %v848_v34  ;;  %v849_v36 = vmul.f32 %v1319_v40, %v1859_v6 }
 0x2a5   :  { %863 = vst.msk [vmem:[%s1972_s8 + $0x68] sm:$0xff] %vm753_vm6, %v847_v35 }
 0x2a6   :  { %865 = vst.msk [vmem:[%s1972_s8 + $0x78] sm:$0xff] %vm753_vm6, %v849_v36 }
 0x2a7   :  { %1342 = dma.done.wait [#allocation5], 16  }
 0x2a8   :  { %1343 = vsyncadd [#allocation5], 4294967280 }
 0x2a9   :  { %1016 = vsyncpa [#allocation5], 1 }

</bundles_post_ra>
